<compile_context>
chip_gen: v6e
topology: v6e:2x2x1
jax: 0.10.0
libtpu: 0.0.40
codegen_flags: <defaults>
</compile_context>

<pallas_src>
import functools

import jax
import jax.numpy as jnp
import numpy as np
from jax import lax
from jax.experimental import pallas as pl
from jax.experimental.pallas import tpu as pltpu


def _share_sep_conv_kernel(w_ref, x_ref, o_ref, *, k, H, W, n_sub, sub, w_chunk):
    """One grid step: full spatial extent, one batch block.

    w_ref: (k, k)                        shared spatial weight, f32   (SMEM)
    x_ref: (H+k-1, W+k-1, St, 128)       zero-padded input block      (VMEM)
    o_ref: (H, W, St, 128)               output block                 (VMEM)

    St = n_sub * sub; the flattened batch sits on the (sublane, lane) = (St, 128)
    axes, so spatial shifts never touch the vreg-internal axes.  The accumulator
    covers a single (w_chunk, sub, 128) row block and therefore stays in vregs:
    each output row is stored exactly once and never read back.
    """
    # Hoist the k*k scalar weight reads (SMEM) out of every loop.
    w = [[w_ref[i, j] for j in range(k)] for i in range(k)]

    def sub_body(s, carry):
        # Aligned sublane offset of this batch sub-chunk (sub == 8 whenever n_sub > 1).
        off = pl.multiple_of(s * sub, sub)

        def row_body(h, carry_in):
            for w0 in range(0, W, w_chunk):        # static; one chunk when W <= w_chunk
                wc = min(w_chunk, W - w0)
                acc = None
                for i in range(k):                 # k is small & static -> fully unrolled
                    # One aligned load (+ one upcast) per (h, i); the k j-shifted windows
                    # below are free vreg-subset slices of this in-register row.
                    row = x_ref[h + i, w0:w0 + wc + k - 1,
                                pl.ds(off, sub), :].astype(jnp.float32)
                    for j in range(k):
                        term = w[i][j] * row[j:j + wc]
                        acc = term if acc is None else acc + term   # first term initialises acc
                # Store each output row block exactly once (unmasked, lane-dense).
                o_ref[h, w0:w0 + wc, pl.ds(off, sub), :] = acc.astype(o_ref.dtype)
            return carry_in

        return lax.fori_loop(0, H, row_body, carry)

    lax.fori_loop(0, n_sub, sub_body, 0)


def _vmem_caps():
    """(block budget, scoped-vmem limit) in bytes, sized per TPU generation."""
    try:
        info = pltpu.get_tpu_info()
        cap = int(getattr(info, "vmem_capacity_bytes", 64 * 1024 * 1024))
    except Exception:
        cap = 64 * 1024 * 1024                      # be v7x-conservative if the query fails
    cap = max(cap, 32 * 1024 * 1024)
    limit = min(cap * 3 // 4, 100 * 1024 * 1024)    # ~96 MiB on v5e/v6e, ~48 MiB on v7x
    budget = limit * 3 // 4                         # headroom for Mosaic internal scratch
    return budget, limit


def _choose_batch_block(S, sub, Hp, Wp, H, W, itemsize, budget, max_units=8):
    """Batch sublane extent St per grid block, or None if one unit does not fit VMEM."""
    # Double-buffered input + output bytes for one `sub`-sublane (sub*128 batch) unit.
    per_unit = 2 * (Hp * Wp + H * W) * sub * 128 * itemsize
    if per_unit > budget:
        return None
    n_units = S // sub
    m = int(min(budget // per_unit, n_units, max_units))
    m = max(m, 1)
    # Keep >= 2 grid steps when possible: both v7x TensorCores get work and the
    # input-prefetch / output-writeback pipeline has something to overlap.
    if n_units // m < 2 and n_units >= 2:
        m = max(1, n_units // 2)
    while n_units % m != 0:
        m -= 1
    return m * sub


def _share_sep_conv3d_xla(x, weight):
    """Pure-JAX reference / fallback (identical math: shift-and-add cross-correlation)."""
    N, C, D, H, W = x.shape
    k = int(weight.shape[-1])
    p = (k - 1) // 2
    w = jnp.asarray(weight).reshape(k, k).astype(jnp.float32)
    xp = jnp.pad(x, ((0, 0), (0, 0), (0, 0), (p, p), (p, p)))
    out = None
    for i in range(k):
        for j in range(k):
            term = w[i, j] * xp[:, :, :, i:i + H, j:j + W].astype(jnp.float32)
            out = term if out is None else out + term
    return out.astype(x.dtype)


def share_sep_conv3d(x, weight):
    """ShareSepConv3d forward.

    x:      (N, C, D, H, W) NCDHW input.
    weight: (k, k) shared spatial kernel (the module's (1,1,1,k,k) parameter squeezed),
            or the raw (1,1,1,k,k) tensor.

    Equivalent to F.conv3d(x, weight.expand(C,1,1,k,k), None, 1, (0, p, p), 1, C).
    """
    N, C, D, H, W = map(int, x.shape)
    k = int(weight.shape[-1])
    assert k % 2 == 1, "kernel size should be odd"
    p = (k - 1) // 2
    Hp, Wp = H + 2 * p, W + 2 * p
    B = N * C * D

    weight = jnp.asarray(weight).reshape(k, k).astype(jnp.float32)
    itemsize = jnp.dtype(x.dtype).itemsize
    budget, vmem_limit = _vmem_caps()

    # Flattened batch -> (S, 128) = (sublane, lane).  Once S exceeds one sublane tile it is
    # rounded up to a multiple of 8 so every block stays (8,128)-aligned; otherwise a single
    # full-extent batch block is used.
    S = -(-B // 128)
    if S > 8:
        S = -(-S // 8) * 8
        sub = 8
    else:
        sub = S
    Bp = S * 128

    St = _choose_batch_block(S, sub, Hp, Wp, H, W, itemsize, budget)
    if St is None:
        # TODO(synk): tile H with halo rows (manual double-buffered DMA) instead of falling
        # back to XLA when a single batch block no longer fits VMEM (very large H*W).
        return _share_sep_conv3d_xla(x, weight)
    n_sub = St // sub

    # Lane-dense re-layout: (N,C,D,H,W) -> (Hp, Wp, S, 128).  The spatial zero-pad and the
    # batch pad fuse with the transpose into one XLA pass; the trailing reshape is free.
    # TODO(synk): this pre/post relayout is an extra HBM read+write each way for a
    # bandwidth-bound op; removing it needs native-layout slabs via memory_space=pl.ANY +
    # manual DMA with an in-VMEM re-layout, or keeping (H,W,B) as the inter-op layout.
    xt = jnp.transpose(x.reshape(B, H, W), (1, 2, 0))
    xt = jnp.pad(xt, ((p, p), (p, p), (0, Bp - B))).reshape(Hp, Wp, S, 128)

    kernel = functools.partial(_share_sep_conv_kernel, k=k, H=H, W=W,
                               n_sub=n_sub, sub=sub, w_chunk=16)
    cost = pl.CostEstimate(
        flops=2 * k * k * H * W * Bp,
        transcendentals=0,
        bytes_accessed=(Hp * Wp + H * W) * Bp * itemsize)

    out = pl.pallas_call(
        kernel,
        out_shape=jax.ShapeDtypeStruct((H, W, S, 128), x.dtype),
        grid_spec=pltpu.PrefetchScalarGridSpec(
            num_scalar_prefetch=0,
            grid=(S // St,),
            in_specs=[
                pl.BlockSpec(memory_space=pltpu.MemorySpace.SMEM),        # shared (k,k) weight
                pl.BlockSpec((Hp, Wp, St, 128), lambda b: (0, 0, b, 0)),
            ],
            out_specs=pl.BlockSpec((H, W, St, 128), lambda b: (0, 0, b, 0)),
        ),
        compiler_params=pltpu.CompilerParams(
            dimension_semantics=("parallel",),
            vmem_limit_bytes=int(vmem_limit)),
        cost_estimate=cost,
    )(weight, xt)

    # Drop the batch padding and return to NCDHW.
    out = out.reshape(H, W, Bp)[:, :, :B]
    return jnp.transpose(out, (2, 0, 1)).reshape(N, C, D, H, W)


if __name__ == "__main__":
    kernel_size = 3
    p = (kernel_size - 1) // 2

    key = jax.random.PRNGKey(0)
    k_x, k_w = jax.random.split(key)
    N, C, D, H, W = 2, 4, 4, 16, 16
    x = jax.random.normal(k_x, (N, C, D, H, W), dtype=jnp.float32)

    # 1) The module's deterministic init: delta at the center -> identity map.
    w_delta = jnp.zeros((kernel_size, kernel_size), jnp.float32).at[p, p].set(1.0)
    out = jax.block_until_ready(share_sep_conv3d(x, w_delta))
    np.testing.assert_allclose(np.asarray(out), np.asarray(x), rtol=1e-5, atol=1e-5)

    # 2) Asymmetric weight vs. a pure-JAX reference (catches flipped-kernel or
    #    off-by-one padding errors that the delta test cannot see).
    w_rand = jax.random.normal(k_w, (kernel_size, kernel_size), dtype=jnp.float32)
    out2 = jax.block_until_ready(share_sep_conv3d(x, w_rand))
    ref2 = _share_sep_conv3d_xla(x, w_rand)
    np.testing.assert_allclose(np.asarray(out2), np.asarray(ref2), rtol=1e-5, atol=1e-5)

    print("KERNEL_OK")
</pallas_src>

<mosaic_0001>
module attributes {stable_mosaic.version = 11 : i64} {
  func.func @_share_sep_conv_kernel(%arg0: i32, %arg1: memref<3x3xf32, #tpu.memory_space<smem>>, %arg2: memref<18x18x1x128xf32, #tpu.memory_space<vmem>>, %arg3: memref<16x16x1x128xf32, #tpu.memory_space<vmem>>) attributes {dimension_semantics = [#tpu.dimension_semantics<parallel>], iteration_bounds = array<i64: 1>, scalar_prefetch = 0 : i64, scratch_operands = 0 : i64, tpu.core_type = #tpu.core_type<tc>, window_params = [{transform_indices = @transform_0, window_bounds = array<i64: 3, 3>}, {transform_indices = @transform_1, window_bounds = array<i64: 18, 18, 1, 128>}, {transform_indices = @transform_2, window_bounds = array<i64: 16, 16, 1, 128>}]} {
    %c0 = arith.constant 0 : index
    %c0_0 = arith.constant 0 : index
    %0 = memref.load %arg1[%c0, %c0_0] : memref<3x3xf32, #tpu.memory_space<smem>>
    %c0_1 = arith.constant 0 : index
    %c1 = arith.constant 1 : index
    %1 = memref.load %arg1[%c0_1, %c1] : memref<3x3xf32, #tpu.memory_space<smem>>
    %c0_2 = arith.constant 0 : index
    %c2 = arith.constant 2 : index
    %2 = memref.load %arg1[%c0_2, %c2] : memref<3x3xf32, #tpu.memory_space<smem>>
    %c1_3 = arith.constant 1 : index
    %c0_4 = arith.constant 0 : index
    %3 = memref.load %arg1[%c1_3, %c0_4] : memref<3x3xf32, #tpu.memory_space<smem>>
    %c1_5 = arith.constant 1 : index
    %c1_6 = arith.constant 1 : index
    %4 = memref.load %arg1[%c1_5, %c1_6] : memref<3x3xf32, #tpu.memory_space<smem>>
    %c1_7 = arith.constant 1 : index
    %c2_8 = arith.constant 2 : index
    %5 = memref.load %arg1[%c1_7, %c2_8] : memref<3x3xf32, #tpu.memory_space<smem>>
    %c2_9 = arith.constant 2 : index
    %c0_10 = arith.constant 0 : index
    %6 = memref.load %arg1[%c2_9, %c0_10] : memref<3x3xf32, #tpu.memory_space<smem>>
    %c2_11 = arith.constant 2 : index
    %c1_12 = arith.constant 1 : index
    %7 = memref.load %arg1[%c2_11, %c1_12] : memref<3x3xf32, #tpu.memory_space<smem>>
    %c2_13 = arith.constant 2 : index
    %c2_14 = arith.constant 2 : index
    %8 = memref.load %arg1[%c2_13, %c2_14] : memref<3x3xf32, #tpu.memory_space<smem>>
    %c0_i32 = arith.constant 0 : i32
    %c1_i32 = arith.constant 1 : i32
    %9 = arith.muli %c0_i32, %c1_i32 : i32
    %10 = tpu.assume_multiple %9, 1 : i32
    %c0_i32_15 = arith.constant 0 : i32
    %c16_i32 = arith.constant 16 : i32
    %11 = arith.addi %c0_i32_15, %c16_i32 : i32
    %c1_i32_16 = arith.constant 1 : i32
    scf.for %arg4 = %c0_i32_15 to %11 step %c1_i32_16  : i32 {
      %c0_i32_19 = arith.constant 0 : i32
      %12 = arith.addi %arg4, %c0_i32_19 : i32
      %13 = arith.index_cast %12 : i32 to index
      %c0_20 = arith.constant 0 : index
      %14 = arith.index_cast %10 : i32 to index
      %c0_21 = arith.constant 0 : index
      %15 = vector.load %arg2[%13, %c0_20, %14, %c0_21] : memref<18x18x1x128xf32, #tpu.memory_space<vmem>>, vector<1x18x1x128xf32>
      %16 = vector.shape_cast %15 : vector<1x18x1x128xf32> to vector<18x1x128xf32>
      %17 = vector.extract_strided_slice %16 {offsets = [0, 0, 0], sizes = [16, 1, 128], strides = [1, 1, 1]} : vector<18x1x128xf32> to vector<16x1x128xf32>
      %18 = vector.broadcast %0 : f32 to vector<16x1x128xf32>
      %19 = arith.mulf %18, %17 : vector<16x1x128xf32>
      %20 = vector.extract_strided_slice %16 {offsets = [1, 0, 0], sizes = [16, 1, 128], strides = [1, 1, 1]} : vector<18x1x128xf32> to vector<16x1x128xf32>
      %21 = vector.broadcast %1 : f32 to vector<16x1x128xf32>
      %22 = arith.mulf %21, %20 : vector<16x1x128xf32>
      %23 = arith.addf %19, %22 : vector<16x1x128xf32>
      %24 = vector.extract_strided_slice %16 {offsets = [2, 0, 0], sizes = [16, 1, 128], strides = [1, 1, 1]} : vector<18x1x128xf32> to vector<16x1x128xf32>
      %25 = vector.broadcast %2 : f32 to vector<16x1x128xf32>
      %26 = arith.mulf %25, %24 : vector<16x1x128xf32>
      %27 = arith.addf %23, %26 : vector<16x1x128xf32>
      %c1_i32_22 = arith.constant 1 : i32
      %28 = arith.addi %arg4, %c1_i32_22 : i32
      %29 = arith.index_cast %28 : i32 to index
      %c0_23 = arith.constant 0 : index
      %30 = arith.index_cast %10 : i32 to index
      %c0_24 = arith.constant 0 : index
      %31 = vector.load %arg2[%29, %c0_23, %30, %c0_24] : memref<18x18x1x128xf32, #tpu.memory_space<vmem>>, vector<1x18x1x128xf32>
      %32 = vector.shape_cast %31 : vector<1x18x1x128xf32> to vector<18x1x128xf32>
      %33 = vector.extract_strided_slice %32 {offsets = [0, 0, 0], sizes = [16, 1, 128], strides = [1, 1, 1]} : vector<18x1x128xf32> to vector<16x1x128xf32>
      %34 = vector.broadcast %3 : f32 to vector<16x1x128xf32>
      %35 = arith.mulf %34, %33 : vector<16x1x128xf32>
      %36 = arith.addf %27, %35 : vector<16x1x128xf32>
      %37 = vector.extract_strided_slice %32 {offsets = [1, 0, 0], sizes = [16, 1, 128], strides = [1, 1, 1]} : vector<18x1x128xf32> to vector<16x1x128xf32>
      %38 = vector.broadcast %4 : f32 to vector<16x1x128xf32>
      %39 = arith.mulf %38, %37 : vector<16x1x128xf32>
      %40 = arith.addf %36, %39 : vector<16x1x128xf32>
      %41 = vector.extract_strided_slice %32 {offsets = [2, 0, 0], sizes = [16, 1, 128], strides = [1, 1, 1]} : vector<18x1x128xf32> to vector<16x1x128xf32>
      %42 = vector.broadcast %5 : f32 to vector<16x1x128xf32>
      %43 = arith.mulf %42, %41 : vector<16x1x128xf32>
      %44 = arith.addf %40, %43 : vector<16x1x128xf32>
      %c2_i32 = arith.constant 2 : i32
      %45 = arith.addi %arg4, %c2_i32 : i32
      %46 = arith.index_cast %45 : i32 to index
      %c0_25 = arith.constant 0 : index
      %47 = arith.index_cast %10 : i32 to index
      %c0_26 = arith.constant 0 : index
      %48 = vector.load %arg2[%46, %c0_25, %47, %c0_26] : memref<18x18x1x128xf32, #tpu.memory_space<vmem>>, vector<1x18x1x128xf32>
      %49 = vector.shape_cast %48 : vector<1x18x1x128xf32> to vector<18x1x128xf32>
      %50 = vector.extract_strided_slice %49 {offsets = [0, 0, 0], sizes = [16, 1, 128], strides = [1, 1, 1]} : vector<18x1x128xf32> to vector<16x1x128xf32>
      %51 = vector.broadcast %6 : f32 to vector<16x1x128xf32>
      %52 = arith.mulf %51, %50 : vector<16x1x128xf32>
      %53 = arith.addf %44, %52 : vector<16x1x128xf32>
      %54 = vector.extract_strided_slice %49 {offsets = [1, 0, 0], sizes = [16, 1, 128], strides = [1, 1, 1]} : vector<18x1x128xf32> to vector<16x1x128xf32>
      %55 = vector.broadcast %7 : f32 to vector<16x1x128xf32>
      %56 = arith.mulf %55, %54 : vector<16x1x128xf32>
      %57 = arith.addf %53, %56 : vector<16x1x128xf32>
      %58 = vector.extract_strided_slice %49 {offsets = [2, 0, 0], sizes = [16, 1, 128], strides = [1, 1, 1]} : vector<18x1x128xf32> to vector<16x1x128xf32>
      %59 = vector.broadcast %8 : f32 to vector<16x1x128xf32>
      %60 = arith.mulf %59, %58 : vector<16x1x128xf32>
      %61 = arith.addf %57, %60 : vector<16x1x128xf32>
      %62 = arith.index_cast %arg4 : i32 to index
      %c0_27 = arith.constant 0 : index
      %63 = arith.index_cast %10 : i32 to index
      %c0_28 = arith.constant 0 : index
      %64 = vector.load %arg3[%62, %c0_27, %63, %c0_28] : memref<16x16x1x128xf32, #tpu.memory_space<vmem>>, vector<1x16x1x128xf32>
      %65 = vector.shape_cast %64 : vector<1x16x1x128xf32> to vector<16x1x128xf32>
      %66 = vector.shape_cast %61 : vector<16x1x128xf32> to vector<1x16x1x128xf32>
      tpu.vector_store %arg3[%62, %c0_27, %63, %c0_28], %66 {strides = array<i32>} : memref<16x16x1x128xf32, #tpu.memory_space<vmem>>, vector<1x16x1x128xf32>,
    }
    %c16_i32_17 = arith.constant 16 : i32
    %c1_i32_18 = arith.constant 1 : i32
    return
  }
  func.func @transform_0(%arg0: i32) -> (i32, i32) {
    %c0_i32 = arith.constant 0 : i32
    %c0_i32_0 = arith.constant 0 : i32
    %c0_i32_1 = arith.constant 0 : i32
    return %c0_i32, %c0_i32_0 : i32, i32
  }
  func.func @transform_1(%arg0: i32) -> (i32, i32, i32, i32) {
    %c0_i32 = arith.constant 0 : i32
    %c0_i32_0 = arith.constant 0 : i32
    %c0_i32_1 = arith.constant 0 : i32
    %c0_i32_2 = arith.constant 0 : i32
    return %c0_i32, %c0_i32_0, %arg0, %c0_i32_1 : i32, i32, i32, i32
  }
  func.func @transform_2(%arg0: i32) -> (i32, i32, i32, i32) {
    %c0_i32 = arith.constant 0 : i32
    %c0_i32_0 = arith.constant 0 : i32
    %c0_i32_1 = arith.constant 0 : i32
    %c0_i32_2 = arith.constant 0 : i32
    return %c0_i32, %c0_i32_0, %arg0, %c0_i32_1 : i32, i32, i32, i32
  }
}

</mosaic_0001>

<bundles_post_ra>
// kernel: tpu_custom_call.1
= control target key start
LH: loop header
LB: loop body
LE: loop exit
PB: predicated region body
PF: predicated region fallthrough
CT: control target
= control target key end

     0   :  { %7 = vsyncpa [#allocation5], 0  ;;  %s878_s0 = inlined_call_operand.hbm [shape: f32[3,3], index: 0, kind: input, shape index: {}]   ;;  %s879_s1 = inlined_call_operand.hbm [shape: f32[18,18,1,128], index: 1, kind: input, shape index: {}]   ;;  %s880_s2 = inlined_call_operand.hbm [shape: f32[16,16,1,128], index: 2, kind: output, shape index: {}]  }
   0x1   :  { %8 = vsyncpa [#allocation3], 0 }
   0x2   :  { %9 = vsyncpa [#allocation4], 0  ;;  %s570_s9 = smov [#allocation2]   ;;  %s571_s12 = smov [#allocation6]  }
   0x3   :  { %17 = dma.hbm_to_smem %s878_s0, 64, %s570_s9, [#allocation5]  }
   0x4   :  { %s23_s13 = sshll.u32 %s571_s12, 4  ;;  %s24_s13 = int_to_ptr.vmem [resolvable:$true] %s23_s13 }
   0x5   :  { %s524_s14 = scalar_lea.vmem %s24_s13, 5184  ;;  %p529_p1 = scmp.lt.s32.totalorder %s24_s13, %s24_s13 }
   0x6   :  { %p525_p0 = scmp.ne.s32.totalorder %s24_s13, %s524_s14  ;;  %p530_p2 = scmp.lt.s32.totalorder %s524_s14, %s524_s14 }
   0x8   :  { %p531_p3 = por %p530_p2, %p529_p1 }
   0xa   :  { %p532_p4 = pnand %p531_p3, %p525_p0 }
   0xc   :  { %535 = shalt.err (!%p532_p4)
}
   0xd   :  { %s572_s15 = smov 16   ;;  %s573_s16 = smov 1  }
   0xe   :  { %29 = dma.hbm_to_vmem [thread:$0]  %s879_s1, 5184, %s24_s13, [#allocation3], %s572_s15, %s572_s15, %s573_s16  }
   0xf   :  { %560 = dma.done.wait [#allocation5], 64  }
  0x10   :  { %561 = vsyncadd [#allocation5], 4294967232 }
  0x11   :  { %562 = dma.done.wait [#allocation3], 5184  }
  0x12   :  { %563 = vsyncadd [#allocation3], 4294962112 }
  0x13   :  { %36 = sfence }
  0x14   :  { %s599_s0 = sld [smem:[#allocation2]]  ;;  %s617_s26 = smov 0  }
  0x15   :  { %s601_s19 = sld [smem:[#allocation2 + $0x1]] }
  0x16   :  { %s603_s20 = sld [smem:[#allocation2 + $0x2]] }
  0x17   :  { %s605_s21 = sld [smem:[#allocation2 + $0x80]] }
  0x18   :  { %s607_s22 = sld [smem:[#allocation2 + $0x81]] }
  0x19   :  { %s609_s23 = sld [smem:[#allocation2 + $0x82]] }
  0x1a   :  { %s611_s24 = sld [smem:[#allocation2 + $0x100]] }
  0x1b   :  { %s613_s1 = sld [smem:[#allocation2 + $0x101]] }
  0x1c   :  { %s615_s25 = sld [smem:[#allocation2 + $0x102]] }
  0x1d LB: > { %s52_s27 = smul.u32 18, %s568_s26  ;;  %v624_v0 = vstv %s599_s0  ;;  %v627_v1 = vstv %s601_s19  ;;  %v630_v2 = vstv %s603_s20  ;;  %v633_v3 = vstv %s605_s21  ;;  %s494_s29 = sshll.u32 %s568_s26, 4  ;;  %s568_s26 = sphi %s617_s26, %s51_s26  }
  0x1e   : > { %v641_v7 = vstv %s607_s22  ;;  %s711_s30 = scalar_lea.vmem [#allocation7], %s494_s29  ;;  %s51_s26 = sadd.s32 1, %s568_s26  }
  0x1f   : > { %s635_s28 = scalar_lea.vmem [#allocation6], %s52_s27  ;;  %v650_v14 = vstv %s609_s23  ;;  %p48_p5 = scmp.ge.s32.totalorder %s51_s26, 16  }
  0x20   : > { %v55_v4 = vld [vmem:[%s635_s28] sm:$0x1]  ;;  %v56_v5 = vld [vmem:[%s635_s28 + $0x1] sm:$0x1]  ;;  %v57_v6 = vld [vmem:[%s635_s28 + $0x2] sm:$0x1]  ;;  %v654_v16 = vstv %s611_s24 }
  0x21   : > { %v74_v8 = vmul.f32 %v624_v0, %v55_v4  ;;  %v91_v9 = vmul.f32 %v627_v1, %v56_v5  ;;  %v124_v10 = vmul.f32 %v630_v2, %v57_v6  ;;  %v458_v11 = vld [vmem:[%s635_s28 + $0x12] sm:$0x1]  ;;  %v459_v12 = vld [vmem:[%s635_s28 + $0x13] sm:$0x1]  ;;  %v75_v13 = vmul.f32 %v624_v0, %v56_v5  ;;  %v476_v15 = vld [vmem:[%s635_s28 + $0x24] sm:$0x1] }
  0x22   : > { %v657_v17 = vstv %s613_s1  ;;  %v92_v18 = vmul.f32 %v627_v1, %v57_v6  ;;  %v179_v20 = vmul.f32 %v458_v11, %v633_v3  ;;  %v662_v21 = vstv %s615_s25  ;;  %v58_v22 = vld [vmem:[%s635_s28 + $0x3] sm:$0x1]  ;;  %v460_v23 = vld [vmem:[%s635_s28 + $0x14] sm:$0x1]  ;;  %s574_s3 = smov (%p48_p5), [#allocation7]  }
  0x23   : > { %v107_v19 = vadd.f32 %v91_v9, %v74_v8  ;;  %v212_v24 = vmul.f32 %v459_v12, %v641_v7  ;;  %v477_v25 = vld [vmem:[%s635_s28 + $0x25] sm:$0x1]  ;;  %v125_v27 = vmul.f32 %v630_v2, %v58_v22  ;;  %v180_v28 = vmul.f32 %v459_v12, %v633_v3  ;;  %v478_v33 = vld [vmem:[%s635_s28 + $0x26] sm:$0x1]  ;;  %v461_v35 = vld [vmem:[%s635_s28 + $0x15] sm:$0x1] }
  0x24   : > { %v108_v26 = vadd.f32 %v92_v18, %v75_v13  ;;  %v245_v30 = vmul.f32 %v460_v23, %v650_v14  ;;  %v300_v31 = vmul.f32 %v476_v15, %v654_v16  ;;  %v333_v32 = vmul.f32 %v477_v25, %v657_v17  ;;  %v59_v37 = vld [vmem:[%s635_s28 + $0x4] sm:$0x1]  ;;  %v60_v51 = vld [vmem:[%s635_s28 + $0x5] sm:$0x1]  ;;  %v479_v54 = vld [vmem:[%s635_s28 + $0x27] sm:$0x1] }
  0x25   : > { %v140_v29 = vadd.f32 %v124_v10, %v107_v19  ;;  %v213_v36 = vmul.f32 %v460_v23, %v641_v7  ;;  %v76_v38 = vmul.f32 %v624_v0, %v57_v6  ;;  %v93_v39 = vmul.f32 %v627_v1, %v58_v22  ;;  %v462_v56 = vld [vmem:[%s635_s28 + $0x16] sm:$0x1]  ;;  %v463_v18 = vld [vmem:[%s635_s28 + $0x17] sm:$0x1]  ;;  %v61_v19 = vld [vmem:[%s635_s28 + $0x6] sm:$0x1] }
  0x26   : > { %v141_v34 = vadd.f32 %v125_v27, %v108_v26  ;;  %v366_v41 = vmul.f32 %v478_v33, %v662_v21  ;;  %v246_v42 = vmul.f32 %v461_v35, %v650_v14  ;;  %v126_v43 = vmul.f32 %v630_v2, %v59_v37  ;;  %s422_s4 = sshll.u32 (%p48_p5), %s574_s3, 4  ;;  %s423_s4 = int_to_ptr.vmem [resolvable:$true] %s422_s4 }
  0x27   : > { %v195_v40 = vadd.f32 %v179_v20, %v140_v29  ;;  %v301_v45 = vmul.f32 %v477_v25, %v654_v16  ;;  %v109_v46 = vadd.f32 %v93_v39, %v76_v38  ;;  %v181_v47 = vmul.f32 %v460_v23, %v633_v3  ;;  %v62_v39 = vld [vmem:[%s635_s28 + $0x7] sm:$0x1]  ;;  %s536_s5 = scalar_lea.vmem (%p48_p5), %s423_s4, 4096  ;;  %p541_p7 = scmp.lt.s32.totalorder (%p48_p5), %s423_s4, %s423_s4 }
  0x28   : > { %v196_v44 = vadd.f32 %v180_v28, %v141_v34  ;;  %v334_v49 = vmul.f32 %v478_v33, %v657_v17  ;;  %v214_v50 = vmul.f32 %v461_v35, %v641_v7  ;;  %v77_v52 = vmul.f32 %v624_v0, %v58_v22  ;;  %v480_v28 = vld [vmem:[%s635_s28 + $0x28] sm:$0x1]  ;;  %p537_p6 = scmp.ne.s32.totalorder (%p48_p5), %s423_s4, %s536_s5  ;;  %p542_p8 = scmp.lt.s32.totalorder (%p48_p5), %s536_s5, %s536_s5 }
  0x29   : > { %v228_v48 = vadd.f32 %v212_v24, %v195_v40  ;;  %v142_v55 = vadd.f32 %v126_v43, %v109_v46  ;;  %v94_v57 = vmul.f32 %v627_v1, %v59_v37  ;;  %v127_v58 = vmul.f32 %v630_v2, %v60_v51 }
  0x2a   : > { %v229_v53 = vadd.f32 %v213_v36, %v196_v44  ;;  %v367_v60 = vmul.f32 %v479_v54, %v662_v21  ;;  %v247_v61 = vmul.f32 %v462_v56, %v650_v14  ;;  %v302_v62 = vmul.f32 %v478_v33, %v654_v16  ;;  %p543_p9 = por (%p48_p5), %p542_p8, %p541_p7 }
  0x2b   : > { %v261_v59 = vadd.f32 %v245_v30, %v228_v48  ;;  %v197_v4 = vadd.f32 %v181_v47, %v142_v55  ;;  %v110_v5 = vadd.f32 %v94_v57, %v77_v52  ;;  %v182_v6 = vmul.f32 %v461_v35, %v633_v3  ;;  %v481_v47 = vld [vmem:[%s635_s28 + $0x29] sm:$0x1] }
  0x2c   : > { %v262_v63 = vadd.f32 %v246_v42, %v229_v53  ;;  %v335_v9 = vmul.f32 %v479_v54, %v657_v17  ;;  %v215_v10 = vmul.f32 %v462_v56, %v641_v7  ;;  %v78_v11 = vmul.f32 %v624_v0, %v59_v37  ;;  %p544_p10 = pnand (%p48_p5), %p543_p9, %p537_p6 }
  0x2d   : > { %v316_v8 = vadd.f32 %v300_v31, %v261_v59  ;;  %v230_v13 = vadd.f32 %v214_v50, %v197_v4  ;;  %v143_v15 = vadd.f32 %v127_v58, %v110_v5  ;;  %v95_v20 = vmul.f32 %v627_v1, %v60_v51  ;;  %v63_v59 = vld [vmem:[%s635_s28 + $0x8] sm:$0x1]  ;;  %v465_v5 = vld [vmem:[%s635_s28 + $0x19] sm:$0x1] }
  0x2e   : > { %v317_v12 = vadd.f32 %v301_v45, %v262_v63  ;;  %v248_v23 = vmul.f32 %v463_v18, %v650_v14  ;;  %v128_v24 = vmul.f32 %v630_v2, %v61_v19  ;;  %v183_v25 = vmul.f32 %v462_v56, %v633_v3 }
  0x2f   : > { %v349_v22 = vadd.f32 %v333_v32, %v316_v8  ;;  %v263_v27 = vadd.f32 %v247_v61, %v230_v13  ;;  %v198_v29 = vadd.f32 %v182_v6, %v143_v15  ;;  %v111_v30 = vadd.f32 %v95_v20, %v78_v11  ;;  %v482_v8 = vld [vmem:[%s635_s28 + $0x2a] sm:$0x1] }
  0x30   : > { %v350_v26 = vadd.f32 %v334_v49, %v317_v12  ;;  %v368_v33 = vmul.f32 %v480_v28, %v662_v21  ;;  %v303_v34 = vmul.f32 %v479_v54, %v654_v16  ;;  %v216_v32 = vmul.f32 %v463_v18, %v641_v7 }
  0x31   : > { %v382_v31 = vadd.f32 %v366_v41, %v349_v22  ;;  %v318_v36 = vadd.f32 %v302_v62, %v263_v27  ;;  %v231_v37 = vadd.f32 %v215_v10, %v198_v29  ;;  %v144_v38 = vadd.f32 %v128_v24, %v111_v30  ;;  %v464_v41 = vld [vmem:[%s635_s28 + $0x18] sm:$0x1]  ;;  %v64_v24 = vld [vmem:[%s635_s28 + $0x9] sm:$0x1]  ;;  %v483_v27 = vld [vmem:[%s635_s28 + $0x2b] sm:$0x1] }
  0x32   : > { %v383_v35 = vadd.f32 %v367_v60, %v350_v26  ;;  %v336_v40 = vmul.f32 %v480_v28, %v657_v17  ;;  %v79_v42 = vmul.f32 %v624_v0, %v60_v51  ;;  %v96_v43 = vmul.f32 %v627_v1, %v61_v19  ;;  %v466_v29 = vld [vmem:[%s635_s28 + $0x1a] sm:$0x1] }
  0x33   : > { %401 = vst [vmem:[%s711_s30] sm:$0x1] %v382_v31  ;;  %v129_v44 = vmul.f32 %v630_v2, %v62_v39  ;;  %v351_v45 = vadd.f32 %v335_v9, %v318_v36  ;;  %v264_v46 = vadd.f32 %v248_v23, %v231_v37  ;;  %v199_v48 = vadd.f32 %v183_v25, %v144_v38 }
  0x34   : > { %402 = vst [vmem:[%s711_s30 + $0x1] sm:$0x1] %v383_v35  ;;  %v249_v49 = vmul.f32 %v464_v41, %v650_v14  ;;  %v369_v50 = vmul.f32 %v481_v47, %v662_v21  ;;  %v112_v52 = vadd.f32 %v96_v43, %v79_v42  ;;  %v184_v53 = vmul.f32 %v463_v18, %v633_v3  ;;  %v65_v43 = vld [vmem:[%s635_s28 + $0xa] sm:$0x1] }
  0x35   : > { %v384_v51 = vadd.f32 %v368_v33, %v351_v45  ;;  %v319_v54 = vadd.f32 %v303_v34, %v264_v46  ;;  %v232_v55 = vadd.f32 %v216_v32, %v199_v48  ;;  %v304_v56 = vmul.f32 %v480_v28, %v654_v16  ;;  %v484_v45 = vld [vmem:[%s635_s28 + $0x2c] sm:$0x1] }
  0x36   : > { %v145_v57 = vadd.f32 %v129_v44, %v112_v52  ;;  %v217_v58 = vmul.f32 %v464_v41, %v641_v7  ;;  %v80_v60 = vmul.f32 %v624_v0, %v61_v19  ;;  %v97_v61 = vmul.f32 %v627_v1, %v62_v39 }
  0x37   : > { %403 = vst [vmem:[%s711_s30 + $0x2] sm:$0x1] %v384_v51  ;;  %v352_v62 = vadd.f32 %v336_v40, %v319_v54  ;;  %v265_v63 = vadd.f32 %v249_v49, %v232_v55  ;;  %v337_v4 = vmul.f32 %v481_v47, %v657_v17  ;;  %v130_v6 = vmul.f32 %v630_v2, %v63_v59 }
  0x38   : > { %v200_v9 = vadd.f32 %v184_v53, %v145_v57  ;;  %v250_v10 = vmul.f32 %v465_v5, %v650_v14  ;;  %v113_v11 = vadd.f32 %v97_v61, %v80_v60  ;;  %v185_v12 = vmul.f32 %v464_v41, %v633_v3 }
  0x39   : > { %v385_v13 = vadd.f32 %v369_v50, %v352_v62  ;;  %v320_v15 = vadd.f32 %v304_v56, %v265_v63  ;;  %v370_v18 = vmul.f32 %v482_v8, %v662_v21  ;;  %v305_v19 = vmul.f32 %v481_v47, %v654_v16  ;;  %v467_v47 = vld [vmem:[%s635_s28 + $0x1b] sm:$0x1]  ;;  %v66_v62 = vld [vmem:[%s635_s28 + $0xb] sm:$0x1] }
  0x3a   : > { %v233_v20 = vadd.f32 %v217_v58, %v200_v9  ;;  %v146_v22 = vadd.f32 %v130_v6, %v113_v11  ;;  %v218_v23 = vmul.f32 %v465_v5, %v641_v7  ;;  %v81_v25 = vmul.f32 %v624_v0, %v62_v39 }
  0x3b   : > { %404 = vst [vmem:[%s711_s30 + $0x3] sm:$0x1] %v385_v13  ;;  %v353_v26 = vadd.f32 %v337_v4, %v320_v15  ;;  %v338_v28 = vmul.f32 %v482_v8, %v657_v17  ;;  %v98_v30 = vmul.f32 %v627_v1, %v63_v59  ;;  %v131_v31 = vmul.f32 %v630_v2, %v64_v24 }
  0x3c   : > { %v266_v33 = vadd.f32 %v250_v10, %v233_v20  ;;  %v371_v34 = vmul.f32 %v483_v27, %v662_v21  ;;  %v201_v32 = vadd.f32 %v185_v12, %v146_v22  ;;  %v251_v35 = vmul.f32 %v466_v29, %v650_v14 }
  0x3d   : > { %v386_v36 = vadd.f32 %v370_v18, %v353_v26  ;;  %v306_v37 = vmul.f32 %v482_v8, %v654_v16  ;;  %v114_v38 = vadd.f32 %v98_v30, %v81_v25  ;;  %v186_v39 = vmul.f32 %v465_v5, %v633_v3  ;;  %v485_v5 = vld [vmem:[%s635_s28 + $0x2d] sm:$0x1]  ;;  %v468_v8 = vld [vmem:[%s635_s28 + $0x1c] sm:$0x1]  ;;  %v469_v30 = vld [vmem:[%s635_s28 + $0x1d] sm:$0x1] }
  0x3e   : > { %v321_v40 = vadd.f32 %v305_v19, %v266_v33  ;;  %v234_v41 = vadd.f32 %v218_v23, %v201_v32  ;;  %v339_v42 = vmul.f32 %v483_v27, %v657_v17  ;;  %v82_v44 = vmul.f32 %v624_v0, %v63_v59 }
  0x3f   : > { %405 = vst [vmem:[%s711_s30 + $0x4] sm:$0x1] %v386_v36  ;;  %v147_v46 = vadd.f32 %v131_v31, %v114_v38  ;;  %v219_v48 = vmul.f32 %v466_v29, %v641_v7  ;;  %v99_v49 = vmul.f32 %v627_v1, %v64_v24  ;;  %v132_v50 = vmul.f32 %v630_v2, %v65_v43  ;;  %v67_v31 = vld [vmem:[%s635_s28 + $0xc] sm:$0x1] }
  0x40   : > { %v354_v52 = vadd.f32 %v338_v28, %v321_v40  ;;  %v267_v53 = vadd.f32 %v251_v35, %v234_v41  ;;  %v372_v51 = vmul.f32 %v484_v45, %v662_v21  ;;  %v252_v54 = vmul.f32 %v467_v47, %v650_v14 }
  0x41   : > { %v202_v55 = vadd.f32 %v186_v39, %v147_v46  ;;  %v307_v56 = vmul.f32 %v483_v27, %v654_v16  ;;  %v115_v57 = vadd.f32 %v99_v49, %v82_v44  ;;  %v187_v58 = vmul.f32 %v466_v29, %v633_v3  ;;  %v486_v39 = vld [vmem:[%s635_s28 + $0x2e] sm:$0x1]  ;;  %v487_v49 = vld [vmem:[%s635_s28 + $0x2f] sm:$0x1] }
  0x42   : > { %v387_v59 = vadd.f32 %v371_v34, %v354_v52  ;;  %v322_v60 = vadd.f32 %v306_v37, %v267_v53  ;;  %v220_v61 = vmul.f32 %v467_v47, %v641_v7  ;;  %v83_v63 = vmul.f32 %v624_v0, %v64_v24  ;;  %v68_v52 = vld [vmem:[%s635_s28 + $0xd] sm:$0x1] }
  0x43   : > { %v235_v4 = vadd.f32 %v219_v48, %v202_v55  ;;  %v148_v6 = vadd.f32 %v132_v50, %v115_v57  ;;  %v100_v9 = vmul.f32 %v627_v1, %v65_v43  ;;  %v133_v10 = vmul.f32 %v630_v2, %v66_v62 }
  0x44   : > { %406 = vst [vmem:[%s711_s30 + $0x5] sm:$0x1] %v387_v59  ;;  %v355_v11 = vadd.f32 %v339_v42, %v322_v60  ;;  %v340_v12 = vmul.f32 %v484_v45, %v657_v17  ;;  %v373_v13 = vmul.f32 %v485_v5, %v662_v21  ;;  %v253_v15 = vmul.f32 %v468_v8, %v650_v14 }
  0x45   : > { %v268_v18 = vadd.f32 %v252_v54, %v235_v4  ;;  %v203_v19 = vadd.f32 %v187_v58, %v148_v6  ;;  %v116_v20 = vadd.f32 %v100_v9, %v83_v63  ;;  %v188_v22 = vmul.f32 %v467_v47, %v633_v3  ;;  %v470_v54 = vld [vmem:[%s635_s28 + $0x1e] sm:$0x1]  ;;  %v69_v9 = vld [vmem:[%s635_s28 + $0xe] sm:$0x1] }
  0x46   : > { %v388_v23 = vadd.f32 %v372_v51, %v355_v11  ;;  %v308_v24 = vmul.f32 %v484_v45, %v654_v16  ;;  %v221_v25 = vmul.f32 %v468_v8, %v641_v7  ;;  %v84_v26 = vmul.f32 %v624_v0, %v65_v43  ;;  %v488_v11 = vld [vmem:[%s635_s28 + $0x30] sm:$0x1] }
  0x47   : > { %v323_v27 = vadd.f32 %v307_v56, %v268_v18  ;;  %v236_v28 = vadd.f32 %v220_v61, %v203_v19  ;;  %v149_v29 = vadd.f32 %v133_v10, %v116_v20  ;;  %v101_v33 = vmul.f32 %v627_v1, %v66_v62 }
  0x48   : > { %407 = vst [vmem:[%s711_s30 + $0x6] sm:$0x1] %v388_v23  ;;  %v341_v34 = vmul.f32 %v485_v5, %v657_v17  ;;  %v254_v32 = vmul.f32 %v469_v30, %v650_v14  ;;  %v134_v35 = vmul.f32 %v630_v2, %v67_v31  ;;  %v189_v36 = vmul.f32 %v468_v8, %v633_v3 }
  0x49   : > { %v356_v37 = vadd.f32 %v340_v12, %v323_v27  ;;  %v269_v38 = vadd.f32 %v253_v15, %v236_v28  ;;  %v204_v40 = vadd.f32 %v188_v22, %v149_v29  ;;  %v117_v41 = vadd.f32 %v101_v33, %v84_v26  ;;  %v70_v33 = vld [vmem:[%s635_s28 + $0xf] sm:$0x1] }
  0x4a   : > { %v374_v42 = vmul.f32 %v486_v39, %v662_v21  ;;  %v309_v43 = vmul.f32 %v485_v5, %v654_v16  ;;  %v222_v44 = vmul.f32 %v469_v30, %v641_v7  ;;  %v85_v45 = vmul.f32 %v624_v0, %v66_v62 }
  0x4b   : > { %v389_v46 = vadd.f32 %v373_v13, %v356_v37  ;;  %v324_v47 = vadd.f32 %v308_v24, %v269_v38  ;;  %v237_v48 = vadd.f32 %v221_v25, %v204_v40  ;;  %v150_v50 = vadd.f32 %v134_v35, %v117_v41  ;;  %v471_v13 = vld [vmem:[%s635_s28 + $0x1f] sm:$0x1]  ;;  %v489_v35 = vld [vmem:[%s635_s28 + $0x31] sm:$0x1]  ;;  %v472_v37 = vld [vmem:[%s635_s28 + $0x20] sm:$0x1] }
  0x4c   : > { %v342_v53 = vmul.f32 %v486_v39, %v657_v17  ;;  %v375_v51 = vmul.f32 %v487_v49, %v662_v21  ;;  %v102_v55 = vmul.f32 %v627_v1, %v67_v31  ;;  %v135_v56 = vmul.f32 %v630_v2, %v68_v52 }
  0x4d   : > { %408 = vst [vmem:[%s711_s30 + $0x7] sm:$0x1] %v389_v46  ;;  %v357_v57 = vadd.f32 %v341_v34, %v324_v47  ;;  %v270_v58 = vadd.f32 %v254_v32, %v237_v48  ;;  %v205_v59 = vadd.f32 %v189_v36, %v150_v50  ;;  %v255_v60 = vmul.f32 %v470_v54, %v650_v14 }
  0x4e   : > { %v310_v61 = vmul.f32 %v486_v39, %v654_v16  ;;  %v343_v62 = vmul.f32 %v487_v49, %v657_v17  ;;  %v118_v63 = vadd.f32 %v102_v55, %v85_v45  ;;  %v190_v4 = vmul.f32 %v469_v30, %v633_v3  ;;  %v473_v55 = vld [vmem:[%s635_s28 + $0x21] sm:$0x1] }
  0x4f   : > { %v390_v5 = vadd.f32 %v374_v42, %v357_v57  ;;  %v325_v6 = vadd.f32 %v309_v43, %v270_v58  ;;  %v238_v8 = vadd.f32 %v222_v44, %v205_v59  ;;  %v86_v10 = vmul.f32 %v624_v0, %v67_v31 }
  0x50   : > { %v151_v12 = vadd.f32 %v135_v56, %v118_v63  ;;  %v223_v15 = vmul.f32 %v470_v54, %v641_v7  ;;  %v103_v18 = vmul.f32 %v627_v1, %v68_v52  ;;  %v136_v19 = vmul.f32 %v630_v2, %v69_v9  ;;  %v71_v56 = vld [vmem:[%s635_s28 + $0x10] sm:$0x1] }
  0x51   : > { %409 = vst [vmem:[%s711_s30 + $0x8] sm:$0x1] %v390_v5  ;;  %v358_v20 = vadd.f32 %v342_v53, %v325_v6  ;;  %v271_v22 = vadd.f32 %v255_v60, %v238_v8  ;;  %v376_v23 = vmul.f32 %v488_v11, %v662_v21  ;;  %v256_v24 = vmul.f32 %v471_v13, %v650_v14  ;;  %v72_v8 = vld [vmem:[%s635_s28 + $0x11] sm:$0x1] }
  0x52   : > { %v206_v25 = vadd.f32 %v190_v4, %v151_v12  ;;  %v311_v26 = vmul.f32 %v487_v49, %v654_v16  ;;  %v119_v27 = vadd.f32 %v103_v18, %v86_v10  ;;  %v191_v28 = vmul.f32 %v470_v54, %v633_v3  ;;  %v490_v4 = vld [vmem:[%s635_s28 + $0x32] sm:$0x1] }
  0x53   : > { %v391_v29 = vadd.f32 %v375_v51, %v358_v20  ;;  %v326_v30 = vadd.f32 %v310_v61, %v271_v22  ;;  %v224_v31 = vmul.f32 %v471_v13, %v641_v7  ;;  %v87_v34 = vmul.f32 %v624_v0, %v68_v52  ;;  %v474_v22 = vld [vmem:[%s635_s28 + $0x22] sm:$0x1] }
  0x54   : > { %v239_v32 = vadd.f32 %v223_v15, %v206_v25  ;;  %v152_v36 = vadd.f32 %v136_v19, %v119_v27  ;;  %v104_v38 = vmul.f32 %v627_v1, %v69_v9  ;;  %v137_v39 = vmul.f32 %v630_v2, %v70_v33  ;;  %v491_v27 = vld [vmem:[%s635_s28 + $0x33] sm:$0x1] }
  0x55   : > { %410 = vst [vmem:[%s711_s30 + $0x9] sm:$0x1] %v391_v29  ;;  %v359_v40 = vadd.f32 %v343_v62, %v326_v30  ;;  %v344_v41 = vmul.f32 %v488_v11, %v657_v17  ;;  %v377_v42 = vmul.f32 %v489_v35, %v662_v21  ;;  %v257_v43 = vmul.f32 %v472_v37, %v650_v14 }
  0x56   : > { %v272_v44 = vadd.f32 %v256_v24, %v239_v32  ;;  %v207_v45 = vadd.f32 %v191_v28, %v152_v36  ;;  %v120_v46 = vadd.f32 %v104_v38, %v87_v34  ;;  %v192_v47 = vmul.f32 %v471_v13, %v633_v3 }
  0x57   : > { %v392_v48 = vadd.f32 %v376_v23, %v359_v40  ;;  %v312_v49 = vmul.f32 %v488_v11, %v654_v16  ;;  %v225_v50 = vmul.f32 %v472_v37, %v641_v7  ;;  %v88_v52 = vmul.f32 %v624_v0, %v69_v9  ;;  %v492_v40 = vld [vmem:[%s635_s28 + $0x34] sm:$0x1] }
  0x58   : > { %v327_v53 = vadd.f32 %v311_v26, %v272_v44  ;;  %v240_v51 = vadd.f32 %v224_v31, %v207_v45  ;;  %v153_v54 = vadd.f32 %v137_v39, %v120_v46  ;;  %v105_v57 = vmul.f32 %v627_v1, %v70_v33 }
  0x59   : > { %411 = vst [vmem:[%s711_s30 + $0xa] sm:$0x1] %v392_v48  ;;  %v345_v58 = vmul.f32 %v489_v35, %v657_v17  ;;  %v258_v59 = vmul.f32 %v473_v55, %v650_v14  ;;  %v138_v60 = vmul.f32 %v630_v2, %v71_v56  ;;  %v193_v61 = vmul.f32 %v472_v37, %v633_v3 }
  0x5a   : > { %v360_v62 = vadd.f32 %v344_v41, %v327_v53  ;;  %v273_v63 = vadd.f32 %v257_v43, %v240_v51  ;;  %v208_v5 = vadd.f32 %v192_v47, %v153_v54  ;;  %v121_v6 = vadd.f32 %v105_v57, %v88_v52  ;;  %v493_v47 = vld [vmem:[%s635_s28 + $0x35] sm:$0x1] }
  0x5b   : > { %v378_v9 = vmul.f32 %v490_v4, %v662_v21  ;;  %v313_v10 = vmul.f32 %v489_v35, %v654_v16  ;;  %v226_v11 = vmul.f32 %v473_v55, %v641_v7  ;;  %v89_v12 = vmul.f32 %v624_v0, %v70_v33 }
  0x5c   : > { %v393_v13 = vadd.f32 %v377_v42, %v360_v62  ;;  %v328_v15 = vadd.f32 %v312_v49, %v273_v63  ;;  %v241_v18 = vadd.f32 %v225_v50, %v208_v5  ;;  %v154_v19 = vadd.f32 %v138_v60, %v121_v6 }
  0x5d   : > { %v346_v20 = vmul.f32 %v490_v4, %v657_v17  ;;  %v106_v23 = vmul.f32 %v627_v1, %v71_v56  ;;  %v139_v24 = vmul.f32 %v630_v2, %v72_v8  ;;  %v259_v0 = vmul.f32 %v474_v22, %v650_v14  ;;  %v475_v2 = vld [vmem:[%s635_s28 + $0x23] sm:$0x1] }
  0x5e   : > { %412 = vst [vmem:[%s711_s30 + $0xb] sm:$0x1] %v393_v13  ;;  %v361_v25 = vadd.f32 %v345_v58, %v328_v15  ;;  %v274_v26 = vadd.f32 %v258_v59, %v241_v18  ;;  %v209_v28 = vadd.f32 %v193_v61, %v154_v19  ;;  %v379_v29 = vmul.f32 %v491_v27, %v662_v21 }
  0x5f   : > { %v122_v30 = vadd.f32 %v106_v23, %v89_v12  ;;  %v194_v31 = vmul.f32 %v473_v55, %v633_v3  ;;  %v314_v1 = vmul.f32 %v490_v4, %v654_v16  ;;  %v227_v36 = vmul.f32 %v474_v22, %v641_v7 }
  0x60   : > { %v394_v33 = vadd.f32 %v378_v9, %v361_v25  ;;  %v329_v34 = vadd.f32 %v313_v10, %v274_v26  ;;  %v242_v32 = vadd.f32 %v226_v11, %v209_v28  ;;  %v347_v39 = vmul.f32 %v491_v27, %v657_v17 }
  0x61   : > { %v155_v35 = vadd.f32 %v139_v24, %v122_v30  ;;  %v260_v3 = vmul.f32 %v475_v2, %v650_v14  ;;  %v380_v44 = vmul.f32 %v492_v40, %v662_v21  ;;  %v315_v46 = vmul.f32 %v491_v27, %v654_v16 }
  0x62   : > { %413 = vst [vmem:[%s711_s30 + $0xc] sm:$0x1] %v394_v33  ;;  %v362_v37 = vadd.f32 %v346_v20, %v329_v34  ;;  %v275_v38 = vadd.f32 %v259_v0, %v242_v32  ;;  %v348_v49 = vmul.f32 %v492_v40, %v657_v17  ;;  %v381_v53 = vmul.f32 %v493_v47, %v662_v21 }
  0x63   : > { %v210_v41 = vadd.f32 %v194_v31, %v155_v35 }
  0x64   : > { %v395_v42 = vadd.f32 %v379_v29, %v362_v37  ;;  %v330_v43 = vadd.f32 %v314_v1, %v275_v38 }
  0x65   : > { %v243_v45 = vadd.f32 %v227_v36, %v210_v41 }
  0x66   : > { %414 = vst [vmem:[%s711_s30 + $0xd] sm:$0x1] %v395_v42  ;;  %v363_v7 = vadd.f32 %v347_v39, %v330_v43 }
  0x67   : > { %v276_v48 = vadd.f32 %v260_v3, %v243_v45 }
  0x68   : > { %v396_v50 = vadd.f32 %v380_v44, %v363_v7 }
  0x69   : > { %v331_v52 = vadd.f32 %v315_v46, %v276_v48 }
  0x6a   : > { %415 = vst [vmem:[%s711_s30 + $0xe] sm:$0x1] %v396_v50 }
  0x6b   : > { %v364_v14 = vadd.f32 %v348_v49, %v331_v52  ;;  %50 = sbr.rel (!%p48_p5) target bundleno = 29 (0x1d), region = 47 }
  0x6d   : > { %v397_v51 = vadd.f32 %v381_v53, %v364_v14 }
  0x6f   : > { %416 = vst [vmem:[%s711_s30 + $0xf] sm:$0x1] %v397_v51 }
  0x70   :  { %547 = shalt.err (!%p544_p10)
}
  0x71   :  { %428 = dma.vmem_to_hbm [thread:$0]  %s423_s4, 4096, %s880_s2, [#allocation4], %s572_s15, %s572_s15, %s573_s16  }
  0x72   :  { %564 = dma.done.wait [#allocation4], 4096  }
  0x73   :  { %565 = vsyncadd [#allocation4], 4294963200 }
  0x74   :  { %432 = vsyncpa [#allocation3], 1 }
  0x75   :  { %433 = vsyncpa [#allocation4], 1 }
  0x76   :  { %434 = vsyncpa [#allocation5], 1 }

</bundles_post_ra>
